<compile_context>
chip_gen: v6e
topology: v6e:2x2x1
jax: 0.10.0
libtpu: 0.0.40
codegen_flags: <defaults>
</compile_context>

<pallas_src>
import functools

import jax
import jax.numpy as jnp
from jax.experimental import pallas as pl
from jax.experimental.pallas import tpu as pltpu

N_NODES = 10                    # 160 = 10 nodes * 16 channels (from Linear(160,10))
F_IN = 8
F_OUT = 16
IN_FLAT = N_NODES * F_IN        # 80
HIDDEN_FLAT = N_NODES * F_OUT   # 160
OUT_DIM = 10


def _gcn_affine_kernel(x_ref, w_ref, o_ref):
    # x_ref: [bt, 80]   flattened node features (node-major, channel-minor)
    # w_ref: [81, 10]   rows 0..79 = W_eff, row 80 = b_eff (single packed slab)
    # o_ref: [bt, 10]
    w = w_ref[0:IN_FLAT, :]                  # [80, 10] static, aligned slice
    b = w_ref[IN_FLAT:IN_FLAT + 1, :]        # [1, 10]
    o_ref[...] = jnp.dot(x_ref[...], w,
                         preferred_element_type=jnp.float32) + b


def gcn_norm_adj(edge_index, num_nodes):
    """Dense D^{-1/2}(A+I)D^{-1/2} from edge_index [2, E] (PyG gcn_norm semantics).

    Scatter glue in plain JAX; for a static graph call ONCE outside the hot path.
    """
    src = edge_index[0]
    dst = edge_index[1]
    loop = jnp.arange(num_nodes, dtype=edge_index.dtype)
    src = jnp.concatenate([src, loop])
    dst = jnp.concatenate([dst, loop])
    w = jnp.ones(src.shape[0], jnp.float32)
    deg = jnp.zeros((num_nodes,), jnp.float32).at[dst].add(w)
    dinv = jnp.where(deg > 0, jax.lax.rsqrt(deg), 0.0)
    norm = dinv[src] * w * dinv[dst]
    adj = jnp.zeros((num_nodes, num_nodes), jnp.float32).at[dst, src].add(norm)
    return adj


def prepare_params(params, adj):
    """One-time host-side collapse of the static affine chain (review item 1+4).

    Valid because GCNConv -> flatten -> Linear has no nonlinearity in between.
    """
    wg_t = jnp.asarray(params["wg"], jnp.float32).T                    # [F_IN, F_OUT]
    bg = jnp.asarray(params["bg"], jnp.float32)                        # [F_OUT]
    bl = jnp.asarray(params["bl"], jnp.float32)                        # [OUT_DIM]
    # Linear weight [OUT_DIM,160] -> [160,OUT_DIM] -> [N, F_OUT, OUT_DIM]
    # (row-major flatten of H is node-major, channel-minor -> consistent).
    wl3 = jnp.asarray(params["wl"], jnp.float32).T.reshape(N_NODES, F_OUT, OUT_DIM)

    # W_eff[m,f,o] = sum_{n,k} A[n,m] * Wg_t[f,k] * Wl3[n,k,o]
    w_eff = jnp.einsum("nm,fk,nko->mfo", adj, wg_t, wl3).reshape(IN_FLAT, OUT_DIM)
    b_eff = bl + jnp.einsum("k,nko->o", bg, wl3)                       # [OUT_DIM]

    slab = jnp.concatenate([w_eff, b_eff.reshape(1, OUT_DIM)], axis=0)  # [81, 10]
    return {"w_slab": slab}


@functools.partial(jax.jit, static_argnames=("b_tile",))
def gcn_forward(nodes, prep, b_tile=None):
    B = nodes.shape[0]
    x2d = nodes.reshape(B, IN_FLAT)     # contiguous -> free reshape, no copy
    # Batch tiling only when legal ((8,·) rule) and useful; else one grid step.
    if b_tile is None or b_tile >= B or B % b_tile != 0 or b_tile % 8 != 0:
        b_tile = B
    grid = (B // b_tile,)
    sem = ("parallel",) if grid[0] > 1 else ("arbitrary",)
    return pl.pallas_call(
        _gcn_affine_kernel,
        out_shape=jax.ShapeDtypeStruct((B, OUT_DIM), jnp.float32),
        grid=grid,
        in_specs=[
            pl.BlockSpec((b_tile, IN_FLAT), lambda i: (i, 0)),
            pl.BlockSpec((IN_FLAT + 1, OUT_DIM), lambda i: (0, 0)),
        ],
        out_specs=pl.BlockSpec((b_tile, OUT_DIM), lambda i: (i, 0)),
        compiler_params=pltpu.CompilerParams(dimension_semantics=sem),
    )(x2d, prep["w_slab"])


if __name__ == "__main__":
    key = jax.random.PRNGKey(0)
    k1, k2, k3, k4, k5 = jax.random.split(key, 5)

    B = 2
    nodes = jax.random.normal(k1, (B, N_NODES, F_IN), jnp.float32)

    # deterministic ring graph, both directions: edge_index [2, 2*N]
    i = jnp.arange(N_NODES, dtype=jnp.int32)
    j = (i + 1) % N_NODES
    edge_index = jnp.concatenate(
        [jnp.stack([i, j], axis=0), jnp.stack([j, i], axis=0)], axis=1)

    # synthetic parameters with the shapes of GCNConv(8,16) + Linear(160,10)
    params = {
        "wg": jax.random.normal(k2, (F_OUT, F_IN), jnp.float32) * 0.1,
        "bg": jax.random.normal(k3, (F_OUT,), jnp.float32) * 0.1,
        "wl": jax.random.normal(k4, (OUT_DIM, HIDDEN_FLAT), jnp.float32) * 0.1,
        "bl": jax.random.normal(k5, (OUT_DIM,), jnp.float32) * 0.1,
    }

    # One-time prep, hoisted out of the jitted hot path (static graph + weights).
    adj = gcn_norm_adj(edge_index, N_NODES)
    prep = prepare_params(params, adj)

    out = jax.block_until_ready(gcn_forward(nodes, prep))

    # pure-JAX reference of the original (un-collapsed) forward pass
    h_ref = jnp.einsum("nm,bmf->bnf", adj, nodes @ params["wg"].T) + params["bg"]
    ref = h_ref.reshape(B, -1) @ params["wl"].T + params["bl"]
    assert out.shape == (B, OUT_DIM) and out.dtype == jnp.float32
    assert jnp.allclose(out, ref, atol=1e-4, rtol=1e-4)

    print("KERNEL_OK")
</pallas_src>

<mosaic_0001>
module attributes {stable_mosaic.version = 11 : i64} {
  func.func @_gcn_affine_kernel(%arg0: i32, %arg1: memref<2x80xf32, #tpu.memory_space<vmem>>, %arg2: memref<81x10xf32, #tpu.memory_space<vmem>>, %arg3: memref<2x10xf32, #tpu.memory_space<vmem>>) attributes {dimension_semantics = [#tpu.dimension_semantics<arbitrary>], iteration_bounds = array<i64: 1>, scalar_prefetch = 0 : i64, scratch_operands = 0 : i64, tpu.core_type = #tpu.core_type<tc>, window_params = [{transform_indices = @transform_0, window_bounds = array<i64: 2, 80>}, {pipeline_mode = #tpu.pipeline_mode<synchronous>, transform_indices = @transform_1, window_bounds = array<i64: 81, 10>}, {transform_indices = @transform_2, window_bounds = array<i64: 2, 10>}]} {
    %c0 = arith.constant 0 : index
    %c0_0 = arith.constant 0 : index
    %0 = vector.load %arg2[%c0, %c0_0] : memref<81x10xf32, #tpu.memory_space<vmem>>, vector<80x10xf32>
    %c80 = arith.constant 80 : index
    %c0_1 = arith.constant 0 : index
    %1 = vector.load %arg2[%c80, %c0_1] : memref<81x10xf32, #tpu.memory_space<vmem>>, vector<1x10xf32>
    %c0_2 = arith.constant 0 : index
    %c0_3 = arith.constant 0 : index
    %2 = vector.load %arg1[%c0_2, %c0_3] : memref<2x80xf32, #tpu.memory_space<vmem>>, vector<2x80xf32>
    %cst = arith.constant dense<0.000000e+00> : vector<2x10xf32>
    %3 = tpu.matmul %2, %0, %cst {dimension_numbers = #tpu.dot_dimension_numbers<[1], [0], [0], [1], [0, 0, 1, 1], [], []>} : vector<2x80xf32>, vector<80x10xf32>, vector<2x10xf32> -> vector<2x10xf32>
    %4 = vector.broadcast %1 : vector<1x10xf32> to vector<2x10xf32>
    %5 = arith.addf %3, %4 : vector<2x10xf32>
    %c0_4 = arith.constant 0 : index
    %c0_5 = arith.constant 0 : index
    %6 = vector.load %arg3[%c0_4, %c0_5] : memref<2x10xf32, #tpu.memory_space<vmem>>, vector<2x10xf32>
    tpu.vector_store %arg3[%c0_4, %c0_5], %5 {strides = array<i32>} : memref<2x10xf32, #tpu.memory_space<vmem>>, vector<2x10xf32>,
    return
  }
  func.func @transform_0(%arg0: i32) -> (i32, i32) {
    %c0_i32 = arith.constant 0 : i32
    %c0_i32_0 = arith.constant 0 : i32
    return %arg0, %c0_i32 : i32, i32
  }
  func.func @transform_1(%arg0: i32) -> (i32, i32) {
    %c0_i32 = arith.constant 0 : i32
    %c0_i32_0 = arith.constant 0 : i32
    %c0_i32_1 = arith.constant 0 : i32
    return %c0_i32, %c0_i32_0 : i32, i32
  }
  func.func @transform_2(%arg0: i32) -> (i32, i32) {
    %c0_i32 = arith.constant 0 : i32
    %c0_i32_0 = arith.constant 0 : i32
    return %arg0, %c0_i32 : i32, i32
  }
}

</mosaic_0001>

<bundles_post_ra>
// kernel: gcn_forward.1
= control target key start
LH: loop header
LB: loop body
LE: loop exit
PB: predicated region body
PF: predicated region fallthrough
CT: control target
= control target key end

     0   :  { %v179_v1 = vmov 0.0   ;;  %vm180_vm0 = vmmov 0   ;;  %s236_s0 = inlined_call_operand.vmem [shape: f32[2,80], index: 0, kind: input, shape index: {}]   ;;  %s237_s1 = inlined_call_operand.vmem [shape: f32[81,10], index: 1, kind: input, shape index: {}]   ;;  %s238_s2 = inlined_call_operand.hbm [shape: f32[2,10], index: 2, kind: output, shape index: {}]  }
   0x1   :  { %v21_v0 = vld [vmem:[%s237_s1 + $0x48] sm:$0xff]  ;;  %131 = vmatprep.subr.mxu0 %v179_v1  ;;  %v20_v2 = vld [vmem:[%s237_s1 + $0x40] sm:$0xff]  ;;  %151 = vmatprep.mubr.msk.f32.mxu0 %vm180_vm0, %v179_v1  ;;  %v19_v3 = vld [vmem:[%s237_s1 + $0x38] sm:$0xff] }
   0x2   :  { %132 = vmatpush3.msra.mxu0 %v21_v0 }
   0x3   :  { %133 = vmatprep.subr.mxu0 %v179_v1 }
   0x4   :  { %134 = vmatpush3.msra.mxu0 %v20_v2 }
   0x5   :  { %7 = vsyncpa [#allocation3], 0  ;;  %135 = vmatprep.subr.mxu0 %v179_v1  ;;  %v18_v4 = vld [vmem:[%s237_s1 + $0x30] sm:$0xff]  ;;  %v17_v5 = vld [vmem:[%s237_s1 + $0x28] sm:$0xff]  ;;  %vm28_vm1 = vcmask 654336   ;;  %s181_s5 = smov [#allocation2]  }
   0x6   :  { %136 = vmatpush3.msra.mxu0 %v19_v3  ;;  %v16_v6 = vld [vmem:[%s237_s1 + $0x20] sm:$0xff]  ;;  %v15_v7 = vld [vmem:[%s237_s1 + $0x18] sm:$0xff]  ;;  %v14_v8 = vld [vmem:[%s237_s1 + $0x10] sm:$0xff]  ;;  %s110_s6 = sshll.u32 %s181_s5, 4  ;;  %vm102_vm2 = vcmask 74752   ;;  %s111_s6 = int_to_ptr.vmem [resolvable:$true] %s110_s6 }
   0x7   :  { %137 = vmatprep.subr.mxu0 %v179_v1  ;;  %v13_v9 = vld [vmem:[%s237_s1 + $0x8] sm:$0xff]  ;;  %v12_v10 = vld [vmem:[%s237_s1] sm:$0xff]  ;;  %v118_v12 = vld [vmem:[%s237_s1 + $0x50] ss:$0 sm:$0xff]  ;;  %s157_s7 = scalar_lea.vmem %s111_s6, 32  ;;  %p162_p1 = scmp.lt.s32.totalorder %s111_s6, %s111_s6 }
   0x8   :  { %138 = vmatpush3.msra.mxu0 %v18_v4  ;;  %v23_v11 = vld [vmem:[%s236_s0] sm:$0x3]  ;;  %p158_p0 = scmp.ne.s32.totalorder %s111_s6, %s157_s7  ;;  %p163_p2 = scmp.lt.s32.totalorder %s157_s7, %s157_s7 }
   0x9   :  { %139 = vmatprep.subr.mxu0 %v179_v1 }
   0xa   :  { %140 = vmatpush3.msra.mxu0 %v17_v5  ;;  %p164_p3 = por %p163_p2, %p162_p1 }
   0xb   :  { %141 = vmatprep.subr.mxu0 %v179_v1 }
   0xc   :  { %142 = vmatpush3.msra.mxu0 %v16_v6  ;;  %p165_p4 = pnand %p164_p3, %p158_p0 }
   0xd   :  { %143 = vmatprep.subr.mxu0 %v179_v1 }
   0xe   :  { %144 = vmatpush3.msra.mxu0 %v15_v7 }
   0xf   :  { %145 = vmatprep.subr.mxu0 %v179_v1 }
  0x10   :  { %146 = vmatpush3.msra.mxu0 %v14_v8 }
  0x11   :  { %147 = vmatprep.subr.mxu0 %v179_v1 }
  0x12   :  { %148 = vmatpush3.msra.mxu0 %v13_v9 }
  0x13   :  { %149 = vmatprep.subr.mxu0 %v179_v1 }
  0x14   :  { %150 = vmatpush3.msra.mxu0 %v12_v10 }
  0x15   :  { %152 = vmatmul.mubr.msk.f32.vlgmr.msra.gmra.mxu0 %vm28_vm1, %v23_v11 }
  0xd5   :  { %v98_v13 = vpop.f32.mrf.mxu0 }
  0xd6   :  { %v99_v14 = vadd.f32 %v118_v12, %v98_v13 }
  0xd7   :  { %v153_v15 = vpop.f32.mrf.mxu0 }
  0xd8   :  { %103 = vst.msk [vmem:[#allocation2] sm:$0x3] %vm102_vm2, %v99_v14 }
  0xd9   :  { %168 = shalt.err (!%p165_p4)
}
  0xda   :  { %113 = dma.vmem_to_hbm [thread:$0]  %s111_s6, 32, %s238_s2, [#allocation3]  }
  0xdb   :  { %177 = dma.done.wait [#allocation3], 32  }
  0xdc   :  { %178 = vsyncadd [#allocation3], 4294967264 }
  0xdd   :  { %117 = vsyncpa [#allocation3], 1 }

</bundles_post_ra>
